<compile_context>
chip_gen: v7x
topology: tpu7x:2x2x1
jax: 0.10.0
libtpu: 0.0.40
codegen_flags: <defaults>
</compile_context>

<pallas_src>
import functools

import jax
import jax.numpy as jnp
from jax.experimental import pallas as pl
from jax.experimental.pallas import tpu as pltpu


def _round_up(x: int, m: int) -> int:
    return ((x + m - 1) // m) * m


def _encoder_kernel(nodes_ref, neighs_ref, w_top_ref, w_bot_ref, b_ref, out_ref,
                    *, activation, d_valid):
    # Fused: concat-as-two-dots + bias + activation + row-wise L2 normalize.
    h = jnp.dot(nodes_ref[...], w_top_ref[...], preferred_element_type=jnp.float32)
    h = h + jnp.dot(neighs_ref[...], w_bot_ref[...], preferred_element_type=jnp.float32)
    h = h + b_ref[...]                                   # (TILE_N, D_pad) + (1, D_pad)

    if activation == "relu":
        h = jnp.maximum(h, 0.0)
    elif activation == "sigmoid":
        h = jax.nn.sigmoid(h)
    else:  # 'none' raises in the torch module's forward as well
        raise ValueError(f"Unknown activation: {activation}")

    # Mask padded output columns unconditionally (cheap VPU work) so they can
    # never pollute the row norm, regardless of activation / input dtype.
    d_pad = out_ref.shape[-1]
    if d_valid != d_pad:
        col = jax.lax.broadcasted_iota(jnp.int32, h.shape, 1)
        h = jnp.where(col < d_valid, h, 0.0)

    # F.normalize(p=2, dim=1): h / max(||h||, 1e-12)  ==  h * rsqrt(max(sq, 1e-24))
    sq = jnp.sum(h * h, axis=1, keepdims=True)
    inv = jax.lax.rsqrt(jnp.maximum(sq, 1e-24))
    out_ref[...] = (h * inv).astype(out_ref.dtype)


def _pick_tile_n(n: int, hdim: int, d_pad: int, requested, vmem_budget_bytes: int) -> int:
    # Conservative f32 VMEM accounting (everything counted double-buffered):
    #   resident: W_top + W_bot + bias
    #   per row : nodes tile + neighs tile + output tile
    resident = 4 * (2 * (2 * hdim) * d_pad + 2 * d_pad)
    per_row = 4 * (2 * 2 * hdim + 2 * d_pad)
    max_rows = max(8, (vmem_budget_bytes - resident) // per_row)

    tile = 4096 if requested is None else int(requested)
    tile = int(min(tile, max_rows, _round_up(n, 8)))
    tile = max(8, _round_up(tile, 8))

    # Keep row-padding waste under ~12.5% of total DMA traffic.
    while tile > 8:
        n_pad = _round_up(n, tile)
        if (n_pad - n) * 8 <= n_pad:
            break
        tile = max(8, _round_up(tile // 2, 8))
    return tile


def encoder_forward(nodes_embed, neighs_embed, weight, bias,
                    activation="relu", tile_n=None, matmul_dtype=None):
    """
    nodes_embed  : (N, H) float32
    neighs_embed : (N, H) float32
    weight       : (2*H, D_out) float32   (x @ weight convention, i.e. W.T of nn.Linear)
    bias         : (D_out,) float32
    matmul_dtype : optional dtype (e.g. jnp.bfloat16) for the matmul input
                   streams; accumulation / bias / norm stay in f32.
    """
    n, hdim = nodes_embed.shape
    in_dim, d_out = weight.shape
    assert in_dim == 2 * hdim
    assert neighs_embed.shape == (n, hdim)
    assert bias.shape == (d_out,)

    # --- wrapper-side layout plumbing (no concat, no K padding) -------------
    d_pad = _round_up(d_out, 128)                 # lane-dense output blocks
    vmem_budget = 24 * 1024 * 1024                # safe on v7x (64 MiB VMEM)
    tn = _pick_tile_n(n, hdim, d_pad, tile_n, vmem_budget)
    n_pad = _round_up(n, tn)

    w_top = weight[:hdim]                          # (H, D_out)
    w_bot = weight[hdim:]                          # (H, D_out)
    if d_pad != d_out:
        w_top = jnp.pad(w_top, ((0, 0), (0, d_pad - d_out)))
        w_bot = jnp.pad(w_bot, ((0, 0), (0, d_pad - d_out)))
    b = jnp.pad(bias, (0, d_pad - d_out)).reshape(1, d_pad).astype(jnp.float32)

    x_nodes = nodes_embed
    x_neighs = neighs_embed
    if n_pad != n:
        x_nodes = jnp.pad(x_nodes, ((0, n_pad - n), (0, 0)))
        x_neighs = jnp.pad(x_neighs, ((0, n_pad - n), (0, 0)))

    if matmul_dtype is not None:
        x_nodes = x_nodes.astype(matmul_dtype)
        x_neighs = x_neighs.astype(matmul_dtype)
        w_top = w_top.astype(matmul_dtype)
        w_bot = w_bot.astype(matmul_dtype)

    kernel = functools.partial(_encoder_kernel, activation=activation, d_valid=d_out)

    itemsize = jnp.dtype(matmul_dtype or jnp.float32).itemsize
    cost = pl.CostEstimate(
        flops=2 * n_pad * in_dim * d_pad + 3 * n_pad * d_pad,
        transcendentals=(n_pad * d_pad if activation == "sigmoid" else 0) + n_pad,
        bytes_accessed=itemsize * (2 * n_pad * hdim + in_dim * d_pad)
        + 4 * (d_pad + n_pad * d_pad),
    )

    out_padded = pl.pallas_call(
        kernel,
        out_shape=jax.ShapeDtypeStruct((n_pad, d_pad), jnp.float32),
        grid_spec=pl.GridSpec(
            grid=(n_pad // tn,),
            in_specs=[
                # node / neighbor blocks: tiled over rows, pipelined by Pallas.
                # (Bump to pipeline_mode=pl.Buffered(3) if xprof shows exposed DMA.)
                pl.BlockSpec((tn, hdim), lambda i: (i, 0)),
                pl.BlockSpec((tn, hdim), lambda i: (i, 0)),
                # weights & bias: constant index_map -> resident in VMEM
                pl.BlockSpec((hdim, d_pad), lambda i: (0, 0)),
                pl.BlockSpec((hdim, d_pad), lambda i: (0, 0)),
                pl.BlockSpec((1, d_pad), lambda i: (0, 0)),
            ],
            out_specs=pl.BlockSpec((tn, d_pad), lambda i: (i, 0)),
        ),
        compiler_params=pltpu.CompilerParams(
            # Row blocks are independent. On v7x switch to pltpu.CORE_PARALLEL
            # (with an even number of grid steps) if xprof shows one TC idle.
            dimension_semantics=("parallel",),
            vmem_limit_bytes=32 * 1024 * 1024,
        ),
        cost_estimate=cost,
    )(x_nodes, x_neighs, w_top, w_bot, b)

    # Slice only when padding was actually introduced (the slice is an extra
    # HBM pass; skip it whenever the natural shapes are already TPU-friendly).
    if n_pad == n and d_pad == d_out:
        return out_padded
    return out_padded[:n, :d_out]


def _reference(nodes_embed, neighs_embed, weight, bias):
    embed = jnp.concatenate([nodes_embed, neighs_embed], axis=1)
    h = embed @ weight + bias
    h = jnp.maximum(h, 0.0)
    norm = jnp.sqrt(jnp.sum(h * h, axis=1, keepdims=True))
    return h / jnp.maximum(norm, 1e-12)


if __name__ == "__main__":
    key = jax.random.PRNGKey(0)
    k_nodes, k_neighs, k_w, k_b = jax.random.split(key, 4)

    num_nodes = 8
    hidden_dim = 32           # each of nodes_embed / neighs_embed
    input_dim = 2 * hidden_dim
    output_dim = 64

    nodes_embed = jax.random.normal(k_nodes, (num_nodes, hidden_dim), dtype=jnp.float32)
    neighs_embed = jax.random.normal(k_neighs, (num_nodes, hidden_dim), dtype=jnp.float32)

    # nn.Linear(input_dim, output_dim) init: U(-1/sqrt(in), 1/sqrt(in))
    bound = 1.0 / jnp.sqrt(jnp.float32(input_dim))
    weight = jax.random.uniform(
        k_w, (input_dim, output_dim), minval=-bound, maxval=bound, dtype=jnp.float32
    )
    bias = jax.random.uniform(
        k_b, (output_dim,), minval=-bound, maxval=bound, dtype=jnp.float32
    )

    out = encoder_forward(nodes_embed, neighs_embed, weight, bias, activation="relu")
    out = jax.block_until_ready(out)

    ref = _reference(nodes_embed, neighs_embed, weight, bias)
    assert out.shape == (num_nodes, output_dim)
    assert jnp.allclose(out, ref, atol=1e-5, rtol=1e-5)

    print("KERNEL_OK")
</pallas_src>

<mosaic_0001>
module attributes {stable_mosaic.version = 11 : i64} {
  func.func @_encoder_kernel(%arg0: i32, %arg1: memref<8x32xf32, #tpu.memory_space<vmem>>, %arg2: memref<8x32xf32, #tpu.memory_space<vmem>>, %arg3: memref<32x128xf32, #tpu.memory_space<vmem>>, %arg4: memref<32x128xf32, #tpu.memory_space<vmem>>, %arg5: memref<1x128xf32, #tpu.memory_space<vmem>>, %arg6: memref<8x128xf32, #tpu.memory_space<vmem>>) attributes {dimension_semantics = [#tpu.dimension_semantics<parallel>], iteration_bounds = array<i64: 1>, scalar_prefetch = 0 : i64, scratch_operands = 0 : i64, tpu.core_type = #tpu.core_type<tc>, window_params = [{transform_indices = @transform_0, window_bounds = array<i64: 8, 32>}, {transform_indices = @transform_1, window_bounds = array<i64: 8, 32>}, {pipeline_mode = #tpu.pipeline_mode<synchronous>, transform_indices = @transform_2, window_bounds = array<i64: 32, 128>}, {pipeline_mode = #tpu.pipeline_mode<synchronous>, transform_indices = @transform_3, window_bounds = array<i64: 32, 128>}, {pipeline_mode = #tpu.pipeline_mode<synchronous>, transform_indices = @transform_4, window_bounds = array<i64: 1, 128>}, {transform_indices = @transform_5, window_bounds = array<i64: 8, 128>}]} {
    %c0 = arith.constant 0 : index
    %c0_0 = arith.constant 0 : index
    %0 = vector.load %arg1[%c0, %c0_0] : memref<8x32xf32, #tpu.memory_space<vmem>>, vector<8x32xf32>
    %c0_1 = arith.constant 0 : index
    %c0_2 = arith.constant 0 : index
    %1 = vector.load %arg3[%c0_1, %c0_2] : memref<32x128xf32, #tpu.memory_space<vmem>>, vector<32x128xf32>
    %cst = arith.constant dense<0.000000e+00> : vector<8x128xf32>
    %2 = tpu.matmul %0, %1, %cst {dimension_numbers = #tpu.dot_dimension_numbers<[1], [0], [0], [1], [0, 0, 1, 1], [], []>} : vector<8x32xf32>, vector<32x128xf32>, vector<8x128xf32> -> vector<8x128xf32>
    %c0_3 = arith.constant 0 : index
    %c0_4 = arith.constant 0 : index
    %3 = vector.load %arg2[%c0_3, %c0_4] : memref<8x32xf32, #tpu.memory_space<vmem>>, vector<8x32xf32>
    %c0_5 = arith.constant 0 : index
    %c0_6 = arith.constant 0 : index
    %4 = vector.load %arg4[%c0_5, %c0_6] : memref<32x128xf32, #tpu.memory_space<vmem>>, vector<32x128xf32>
    %cst_7 = arith.constant dense<0.000000e+00> : vector<8x128xf32>
    %5 = tpu.matmul %3, %4, %cst_7 {dimension_numbers = #tpu.dot_dimension_numbers<[1], [0], [0], [1], [0, 0, 1, 1], [], []>} : vector<8x32xf32>, vector<32x128xf32>, vector<8x128xf32> -> vector<8x128xf32>
    %6 = arith.addf %2, %5 : vector<8x128xf32>
    %c0_8 = arith.constant 0 : index
    %c0_9 = arith.constant 0 : index
    %7 = vector.load %arg5[%c0_8, %c0_9] : memref<1x128xf32, #tpu.memory_space<vmem>>, vector<1x128xf32>
    %8 = vector.broadcast %7 : vector<1x128xf32> to vector<8x128xf32>
    %9 = arith.addf %6, %8 : vector<8x128xf32>
    %cst_10 = arith.constant 0.000000e+00 : f32
    %10 = vector.broadcast %cst_10 : f32 to vector<8x128xf32>
    %11 = arith.maximumf %9, %10 : vector<8x128xf32>
    %12 = tpu.iota {dimensions = array<i32: 1>} : vector<8x128xi32>
    %c64_i32 = arith.constant 64 : i32
    %13 = vector.broadcast %c64_i32 : i32 to vector<8x128xi32>
    %14 = arith.cmpi slt, %12, %13 : vector<8x128xi32>
    %cst_11 = arith.constant 0.000000e+00 : f32
    %15 = vector.broadcast %cst_11 : f32 to vector<8x128xf32>
    %16 = arith.select %14, %11, %15 : vector<8x128xi1>, vector<8x128xf32>
    %17 = arith.mulf %16, %16 : vector<8x128xf32>
    %cst_12 = arith.constant dense<0.000000e+00> : vector<8xf32>
    %18 = vector.multi_reduction <add>, %17, %cst_12 [1] : vector<8x128xf32> to vector<8xf32>
    %19 = vector.shape_cast %18 : vector<8xf32> to vector<8x1xf32>
    %cst_13 = arith.constant 1.000000e-24 : f32
    %20 = vector.broadcast %cst_13 : f32 to vector<8x1xf32>
    %21 = arith.maximumf %19, %20 : vector<8x1xf32>
    %22 = math.rsqrt %21 : vector<8x1xf32>
    %23 = vector.broadcast %22 : vector<8x1xf32> to vector<8x128xf32>
    %24 = arith.mulf %16, %23 : vector<8x128xf32>
    %c0_14 = arith.constant 0 : index
    %c0_15 = arith.constant 0 : index
    %25 = vector.load %arg6[%c0_14, %c0_15] : memref<8x128xf32, #tpu.memory_space<vmem>>, vector<8x128xf32>
    tpu.vector_store %arg6[%c0_14, %c0_15], %24 {strides = array<i32>} : memref<8x128xf32, #tpu.memory_space<vmem>>, vector<8x128xf32>,
    return
  }
  func.func @transform_0(%arg0: i32) -> (i32, i32) {
    %c0_i32 = arith.constant 0 : i32
    %c0_i32_0 = arith.constant 0 : i32
    return %arg0, %c0_i32 : i32, i32
  }
  func.func @transform_1(%arg0: i32) -> (i32, i32) {
    %c0_i32 = arith.constant 0 : i32
    %c0_i32_0 = arith.constant 0 : i32
    return %arg0, %c0_i32 : i32, i32
  }
  func.func @transform_2(%arg0: i32) -> (i32, i32) {
    %c0_i32 = arith.constant 0 : i32
    %c0_i32_0 = arith.constant 0 : i32
    %c0_i32_1 = arith.constant 0 : i32
    return %c0_i32, %c0_i32_0 : i32, i32
  }
  func.func @transform_3(%arg0: i32) -> (i32, i32) {
    %c0_i32 = arith.constant 0 : i32
    %c0_i32_0 = arith.constant 0 : i32
    %c0_i32_1 = arith.constant 0 : i32
    return %c0_i32, %c0_i32_0 : i32, i32
  }
  func.func @transform_4(%arg0: i32) -> (i32, i32) {
    %c0_i32 = arith.constant 0 : i32
    %c0_i32_0 = arith.constant 0 : i32
    %c0_i32_1 = arith.constant 0 : i32
    return %c0_i32, %c0_i32_0 : i32, i32
  }
  func.func @transform_5(%arg0: i32) -> (i32, i32) {
    %c0_i32 = arith.constant 0 : i32
    %c0_i32_0 = arith.constant 0 : i32
    return %arg0, %c0_i32 : i32, i32
  }
}

</mosaic_0001>

<bundles_post_ra>
// kernel: tpu_custom_call.1
= control target key start
LH: loop header
LB: loop body
LE: loop exit
PB: predicated region body
PF: predicated region fallthrough
CT: control target
= control target key end

     0   :  { %10 = vsyncpa [#allocation3], 0  ;;  %s546_s0 = inlined_call_operand.hbm [shape: f32[8,32], index: 0, kind: input, shape index: {}]   ;;  %s547_s1 = inlined_call_operand.hbm [shape: f32[8,32], index: 1, kind: input, shape index: {}]   ;;  %s548_s2 = inlined_call_operand.hbm [shape: f32[32,128], index: 2, kind: input, shape index: {}]   ;;  %s549_s3 = inlined_call_operand.hbm [shape: f32[32,128], index: 3, kind: input, shape index: {}]   ;;  %s550_s4 = inlined_call_operand.vmem [shape: f32[1,128], index: 4, kind: input, shape index: {}]   ;;  %s551_s5 = inlined_call_operand.hbm [shape: f32[8,128], index: 5, kind: output, shape index: {}]  }
   0x1   :  { %11 = vsyncpa [#allocation6], 0 }
   0x2   :  { %12 = vsyncpa [#allocation9], 0 }
   0x3   :  { %13 = vsyncpa [#allocation4], 0  ;;  %s443_s18 = smov [#allocation5]   ;;  %s444_s20 = smov [#allocation2]  }
   0x4   :  { %s30_s19 = sshll.u32 %s443_s18, 4  ;;  %s20_s21 = sshll.u32 %s444_s20, 4  ;;  %s31_s19 = int_to_ptr.vmem [resolvable:$true] %s30_s19  ;;  %s21_s21 = int_to_ptr.vmem [resolvable:$true] %s20_s21 }
   0x5   :  { %s325_s24 = scalar_lea.hbm %s547_s1, 128 }
   0x6   :  { %p326_p0 = scmp.ne.s32.totalorder %s547_s1, %s325_s24  ;;  %p329_p1 = scmp.lt.u32.totalorder %s325_s24, %s547_s1 }
   0x8   :  { %p331_p2 = pnand %p329_p1, %p326_p0 }
   0xa   :  { %334 = shalt.err (!%p331_p2)
}
   0xb   :  { %s335_s29 = scalar_lea.vmem %s31_s19, 128  ;;  %p340_p4 = scmp.lt.s32.totalorder %s31_s19, %s31_s19 }
   0xc   :  { %p336_p3 = scmp.ne.s32.totalorder %s31_s19, %s335_s29  ;;  %p341_p5 = scmp.lt.s32.totalorder %s335_s29, %s335_s29 }
   0xe   :  { %p342_p6 = por %p341_p5, %p340_p4 }
  0x10   :  { %p343_p7 = pnand %p342_p6, %p336_p3 }
  0x12   :  { %346 = shalt.err (!%p343_p7)
}
  0x13   :  { %33 = dma.hbm_to_vmem [thread:$0]  %s547_s1, 128, %s31_s19, [#allocation6]  }
  0x14   :  { %s347_s9 = scalar_lea.hbm %s546_s0, 128 }
  0x15   :  { %p348_p8 = scmp.ne.s32.totalorder %s546_s0, %s347_s9  ;;  %p351_p9 = scmp.lt.u32.totalorder %s347_s9, %s546_s0 }
  0x17   :  { %p353_p10 = pnand %p351_p9, %p348_p8 }
  0x19   :  { %356 = shalt.err (!%p353_p10)
}
  0x1a   :  { %s357_s14 = scalar_lea.vmem %s21_s21, 128  ;;  %p362_p12 = scmp.lt.s32.totalorder %s21_s21, %s21_s21 }
  0x1b   :  { %p358_p11 = scmp.ne.s32.totalorder %s21_s21, %s357_s14  ;;  %p363_p13 = scmp.lt.s32.totalorder %s357_s14, %s357_s14 }
  0x1d   :  { %p364_p0 = por %p363_p13, %p362_p12 }
  0x1f   :  { %p365_p1 = pnand %p364_p0, %p358_p11 }
  0x21   :  { %368 = shalt.err (!%p365_p1)
}
  0x22   :  { %23 = dma.hbm_to_vmem [thread:$0]  %s546_s0, 128, %s21_s21, [#allocation3]  }
  0x23   :  { %s445_s16 = smov [#allocation7]   ;;  %s369_s20 = scalar_lea.hbm %s548_s2, 512 }
  0x24   :  { %s39_s17 = sshll.u32 %s445_s16, 4  ;;  %p370_p2 = scmp.ne.s32.totalorder %s548_s2, %s369_s20  ;;  %s40_s17 = int_to_ptr.vmem [resolvable:$true] %s39_s17 }
  0x25   :  { %p373_p3 = scmp.lt.u32.totalorder %s369_s20, %s548_s2 }
  0x27   :  { %p375_p4 = pnand %p373_p3, %p370_p2 }
  0x29   :  { %378 = shalt.err (!%p375_p4)
}
  0x2a   :  { %s379_s26 = scalar_lea.vmem %s40_s17, 512  ;;  %p384_p6 = scmp.lt.s32.totalorder %s40_s17, %s40_s17 }
  0x2b   :  { %p380_p5 = scmp.ne.s32.totalorder %s40_s17, %s379_s26  ;;  %p385_p7 = scmp.lt.s32.totalorder %s379_s26, %s379_s26 }
  0x2d   :  { %p386_p8 = por %p385_p7, %p384_p6 }
  0x2f   :  { %p387_p9 = pnand %p386_p8, %p380_p5 }
  0x31   :  { %390 = shalt.err (!%p387_p9)
}
  0x32   :  { %s446_s0 = smov 128   ;;  %s447_s21 = smov 8  }
  0x33   :  { %45 = dma.hbm_to_vmem [thread:$0]  %s548_s2, 512, %s40_s17, [#allocation6], %s446_s0, %s446_s0, %s447_s21  }
  0x34   :  { %s448_s29 = smov [#allocation8]   ;;  %s391_s8 = scalar_lea.hbm %s549_s3, 512 }
  0x35   :  { %s51_s30 = sshll.u32 %s448_s29, 4  ;;  %p392_p10 = scmp.ne.s32.totalorder %s549_s3, %s391_s8  ;;  %s52_s30 = int_to_ptr.vmem [resolvable:$true] %s51_s30 }
  0x36   :  { %p395_p11 = scmp.lt.u32.totalorder %s391_s8, %s549_s3 }
  0x38   :  { %p397_p12 = pnand %p395_p11, %p392_p10 }
  0x3a   :  { %400 = shalt.err (!%p397_p12)
}
  0x3b   :  { %s401_s13 = scalar_lea.vmem %s52_s30, 512  ;;  %p406_p0 = scmp.lt.s32.totalorder %s52_s30, %s52_s30 }
  0x3c   :  { %p402_p13 = scmp.ne.s32.totalorder %s52_s30, %s401_s13  ;;  %p407_p1 = scmp.lt.s32.totalorder %s401_s13, %s401_s13 }
  0x3e   :  { %p408_p2 = por %p407_p1, %p406_p0 }
  0x40   :  { %p409_p3 = pnand %p408_p2, %p402_p13 }
  0x42   :  { %412 = shalt.err (!%p409_p3)
}
  0x43   :  { %57 = dma.hbm_to_vmem [thread:$0]  %s549_s3, 512, %s52_s30, [#allocation9], %s446_s0, %s446_s0, %s447_s21  }
  0x44   :  { %435 = dma.done.wait [#allocation3], 128  }
  0x45   :  { %436 = vsyncadd [#allocation3], 4294967168 }
  0x46   :  { %437 = dma.done.wait [#allocation6], 640  }
  0x47   :  { %438 = vsyncadd [#allocation6], 4294966656 }
  0x48   :  { %439 = dma.done.wait [#allocation9], 512  }
  0x49   :  { %440 = vsyncadd [#allocation9], 4294966784  ;;  %v449_v0 = vmov 0.0|0.0   ;;  %vm450_vm0 = vmmov 0   ;;  %v451_v1 = vmov 0.0   ;;  %v78_v2 = vld [vmem:[#allocation8] sm:$0xff]  ;;  %v238_v16 = vlaneseq }
  0x4a   :  { %301 = vmatprep.subr.bf16.mxu0 %v449_v0  ;;  %307 = vmatprep.subr.bf16.mxu1 %v449_v0  ;;  %v79_v3 = vld [vmem:[#allocation8 + $0x8] sm:$0xff]  ;;  %v73_v4 = vld [vmem:[#allocation7] sm:$0xff]  ;;  %v80_v7 = vld [vmem:[#allocation8 + $0x10] sm:$0xff]  ;;  %vm82_vm1 = vcmask 261120   ;;  %s452_s15 = smov [#allocation10]  }
  0x4b   :  { %287 = vmatprep.mubr.msk.f32.mxu0 %vm450_vm0, %v451_v1  ;;  %298 = vmatprep.mubr.msk.f32.mxu1 %vm450_vm0, %v451_v1  ;;  %v302_v5 = vpack.c.bf16 %v79_v3, %v78_v2  ;;  %v74_v6 = vld [vmem:[#allocation7 + $0x8] sm:$0xff]  ;;  %v81_v8 = vld [vmem:[#allocation8 + $0x18] sm:$0xff]  ;;  %v75_v10 = vld [vmem:[#allocation7 + $0x10] sm:$0xff]  ;;  %v239_v21 = vand.u32 127, %v238_v16  ;;  %s255_s16 = sshll.u32 %s452_s15, 4  ;;  %s256_s16 = int_to_ptr.vmem [resolvable:$true] %s255_s16 }
  0x4c   :  { %v308_v9 = vpack.c.bf16 %v74_v6, %v73_v4  ;;  %v76_v11 = vld [vmem:[#allocation7 + $0x18] sm:$0xff]  ;;  %v305_v12 = vpack.c.bf16 %v81_v8, %v80_v7  ;;  %v72_v15 = vld [vmem:[#allocation2] sm:$0xff]  ;;  %p418_p5 = scmp.lt.s32.totalorder %s256_s16, %s256_s16 }
  0x4d   :  { %303 = vmatpush3.bf16.msra.mxu0 %v302_v5  ;;  %v311_v13 = vpack.c.bf16 %v76_v11, %v75_v10  ;;  %v77_v14 = vld [vmem:[#allocation5] sm:$0xff]  ;;  %v268_v19 = vld [vmem:[%s550_s4] ss:$0 sm:$0xff]  ;;  %vm240_vm2 = vcmp.lt.s32.totalorder %v239_v21, 64  ;;  %s413_s4 = scalar_lea.vmem %s256_s16, 128 }
  0x4e   :  { %309 = vmatpush3.bf16.msra.mxu1 %v308_v9  ;;  %304 = vmatprep.subr.bf16.mxu0 %v449_v0  ;;  %p414_p4 = scmp.ne.s32.totalorder %s256_s16, %s413_s4  ;;  %p419_p6 = scmp.lt.s32.totalorder %s413_s4, %s413_s4 }
  0x4f   :  { %310 = vmatprep.subr.bf16.mxu1 %v449_v0 }
  0x50   :  { %p420_p7 = por %p419_p6, %p418_p5 }
  0x51   :  { %306 = vmatpush3.bf16.msra.mxu0 %v305_v12 }
  0x52   :  { %312 = vmatpush3.bf16.msra.mxu1 %v311_v13  ;;  %p421_p8 = pnand %p420_p7, %p414_p4 }
  0x54   :  { %288 = vmatmul.mubr.msk.f32.vlgmr.msra.gmra.mrb[0].mxu0 %vm82_vm1, %v77_v14 }
  0x55   :  { %299 = vmatmul.mubr.msk.f32.vlgmr.msra.gmra.mrb[0].mxu1 %vm82_vm1, %v72_v15 }
 0x127   :  { %v152_v17 = vpop.f32.mrb[0].mxu0 }
 0x128   :  { %v225_v18 = vpop.f32.mrb[0].mxu1  ;;  %v289_v20 = vpop.f32.mrb[1].mxu0 }
 0x129   :  { %v226_v22 = vadd.f32 %v225_v18, %v152_v17  ;;  %v300_v23 = vpop.f32.mrb[1].mxu1 }
 0x12b   :  { %v236_v24 = vadd.f32 %v268_v19, %v226_v22 }
 0x12d   :  { %v237_v25 = vmax.f32 %v236_v24, 0.0 }
 0x12f   :  { %v241_v26 = vsel %vm240_vm2, %v237_v25, 0.0 }
 0x130   :  { %v242_v27 = vmul.f32 %v241_v26, %v241_v26 }
 0x132   :  { %243 = vadd.xlane.f32.xlu0 %v242_v27 }
 0x1bf   :  { %v244_v28 = vpop.xlane.xlu0 %243 }
 0x1c0   :  { %v245_v29 = vmax.f32 %v244_v28, 1e-24 }
 0x1c2   :  { %323 = vrsqrt.f32 %v245_v29 }
 0x1cc   :  { %v324_v30 = vpop.eup %323 }
 0x1cd   :  { %v247_v31 = vmul.f32 %v324_v30, %v241_v26 }
 0x1cf   :  { %248 = vst [vmem:[#allocation10] sm:$0xff] %v247_v31 }
 0x1d0   :  { %424 = shalt.err (!%p421_p8)
}
 0x1d1   :  { %s425_s19 = scalar_lea.hbm %s551_s5, 128 }
 0x1d2   :  { %p426_p9 = scmp.ne.s32.totalorder %s551_s5, %s425_s19  ;;  %p429_p10 = scmp.lt.u32.totalorder %s425_s19, %s551_s5 }
 0x1d4   :  { %p431_p11 = pnand %p429_p10, %p426_p9 }
 0x1d6   :  { %434 = shalt.err (!%p431_p11)
}
 0x1d7   :  { %258 = dma.vmem_to_hbm [thread:$0]  %s256_s16, 128, %s551_s5, [#allocation4]  }
 0x1d8   :  { %441 = dma.done.wait [#allocation4], 128  }
 0x1d9   :  { %442 = vsyncadd [#allocation4], 4294967168 }
 0x1da   :  { %262 = vsyncpa [#allocation3], 1 }
 0x1db   :  { %263 = vsyncpa [#allocation6], 1 }
 0x1dc   :  { %264 = vsyncpa [#allocation9], 1 }
 0x1dd   :  { %265 = vsyncpa [#allocation4], 1 }

</bundles_post_ra>
